<compile_context>
chip_gen: v6e
topology: v6e:2x2x1
jax: 0.10.0
libtpu: 0.0.40
codegen_flags: <defaults>
</compile_context>

<pallas_src>
import functools

import jax
import jax.numpy as jnp
from jax.experimental import pallas as pl
from jax.experimental.pallas import tpu as pltpu

_MIB = 1 << 20
_VMEM_TILE_BUDGET = 40 * _MIB   # conservative: fits v7x's 64 MiB/TC with headroom
_VMEM_LIMIT_CAP = 48 * _MIB     # never request more than this scoped VMEM


def _round_up(x, m):
    return (x + m - 1) // m * m


def _pick_tile(d_p, cap):
    """Largest multiple of 128 that divides d_p and is <= cap (d_p itself if <= cap)."""
    if d_p <= cap:
        return d_p
    for t in range(cap - cap % 128, 127, -128):
        if d_p % t == 0:
            return t
    return 128


# -----------------------------------------------------------------------------
# Phase 0: per-feature partial sums (sum, sum of squares) for one row tile.
# -----------------------------------------------------------------------------
def bn_stats_kernel(x_ref, stat_ref):
    x = x_ref[...].astype(jnp.float32)                        # (tile_rows, D_in_p)
    s = jnp.sum(x, axis=0, keepdims=True)                     # (1, D_in_p)
    sq = jnp.sum(x * x, axis=0, keepdims=True)                # (1, D_in_p)
    stat_ref[...] = jnp.concatenate([s, sq], axis=0)[None]    # (1, 2, D_in_p)


# -----------------------------------------------------------------------------
# Phase 1: relu(x @ w_fold + bias), K/N-tiled, resident f32 accumulator.
# -----------------------------------------------------------------------------
def np_block_kernel(x_ref, w_ref, b_ref, o_ref, acc_ref):
    @pl.when(pl.program_id(2) == 0)
    def _():
        acc_ref[...] = jnp.zeros_like(acc_ref)

    acc_ref[...] += jnp.dot(x_ref[...], w_ref[...],
                            preferred_element_type=jnp.float32)

    @pl.when(pl.program_id(2) == pl.num_programs(2) - 1)
    def _():
        o_ref[...] = jnp.maximum(acc_ref[...] + b_ref[...], 0.0).astype(o_ref.dtype)


# -----------------------------------------------------------------------------
# Wrapper
# -----------------------------------------------------------------------------
@functools.partial(jax.jit, static_argnames=("isnorm", "tile_n", "use_bf16_mxu"))
def base_np_block(x, weight, *, isnorm=True, tile_n=512, use_bf16_mxu=False):
    """x: (B, S, D_in); weight: (D_out, D_in) as in nn.Linear (bias=False)."""
    B, S, D_in = x.shape
    D_out = weight.shape[0]
    N = B * S
    eps = jnp.float32(1e-5)

    # Lane-dense feature dims (multiples of 128).
    D_in_p = _round_up(D_in, 128)
    D_out_p = _round_up(D_out, 128)

    # MXU operand dtype: bf16 fast path when the input is bf16 (or on request).
    mxu_dtype = jnp.bfloat16 if (use_bf16_mxu or x.dtype == jnp.bfloat16) else x.dtype
    out_dtype = x.dtype
    x_item = jnp.dtype(mxu_dtype).itemsize
    w_item = x_item
    out_item = jnp.dtype(out_dtype).itemsize

    # ---- Phase-1 tile selection, gated on a VMEM budget (double-buffered tiles + acc).
    tn = min(tile_n, _round_up(N, 8))

    def vmem_usage(tn_, tk_, to_):
        return (2 * tn_ * tk_ * x_item            # x tile (double buffered)
                + 2 * tk_ * to_ * w_item          # weight tile (double buffered)
                + 2 * tn_ * to_ * out_item        # out tile (double buffered)
                + tn_ * to_ * 4                   # f32 accumulator scratch
                + 2 * to_ * 4)                    # bias row

    tk, t_out = D_in_p, D_out_p
    if vmem_usage(tn, tk, t_out) > _VMEM_TILE_BUDGET:
        t_out = _pick_tile(D_out_p, 512)
    if vmem_usage(tn, tk, t_out) > _VMEM_TILE_BUDGET:
        tk = _pick_tile(D_in_p, 512)
    while vmem_usage(tn, tk, t_out) > _VMEM_TILE_BUDGET and tn > 8:
        tn = max(8, _round_up(tn // 2, 8))

    N_p = _round_up(N, tn)

    # ---- Input layout: (N, D_in) view; pad only when necessary (no extra HBM pass).
    x2d = x.reshape(N, D_in)
    if N_p != N or D_in_p != D_in:
        x2d = jnp.pad(x2d, ((0, N_p - N), (0, D_in_p - D_in)))
    if x2d.dtype != mxu_dtype:
        x2d = x2d.astype(mxu_dtype)

    w_f32 = weight.astype(jnp.float32)                        # (D_out, D_in)

    if isnorm:
        # -- Phase 0: batch statistics (HBM-bound; bigger row tile, fully parallel).
        tn_stats = tn
        for mult in (8, 4, 2):
            cand = tn * mult
            if N_p % cand == 0 and 2 * cand * D_in_p * x_item <= 24 * _MIB:
                tn_stats = cand
                break
        num_tiles = N_p // tn_stats
        stats_vmem = int(min(_VMEM_LIMIT_CAP,
                             max(32 * _MIB, 2 * tn_stats * D_in_p * x_item + 4 * _MIB)))

        partial = pl.pallas_call(
            bn_stats_kernel,
            out_shape=jax.ShapeDtypeStruct((num_tiles, 2, D_in_p), jnp.float32),
            grid_spec=pl.GridSpec(
                grid=(num_tiles,),
                in_specs=[pl.BlockSpec((tn_stats, D_in_p), lambda i: (i, 0))],
                out_specs=pl.BlockSpec((1, 2, D_in_p), lambda i: (i, 0, 0)),
            ),
            compiler_params=pltpu.CompilerParams(
                dimension_semantics=("parallel",),
                vmem_limit_bytes=stats_vmem),
        )(x2d)

        stats = jnp.sum(partial, axis=0)                      # (2, D_in_p)
        n_real = jnp.float32(N)                               # padded rows are all-zero
        mean = stats[0, :D_in] / n_real                       # (D_in,)
        var = jnp.maximum(stats[1, :D_in] / n_real - mean * mean, 0.0)  # biased var
        inv_std = jax.lax.rsqrt(var + eps)                    # (D_in,)

        # -- Fold BN into the weight (column scale) and a bias.
        w_fold = w_f32 * inv_std[None, :]                     # (D_out, D_in)
        bias = -(mean * inv_std) @ w_f32.T                    # (D_out,)
    else:
        w_fold = w_f32
        bias = jnp.zeros((D_out,), jnp.float32)

    # One fused weight pass per call: scale (above) + pad + transpose + cast.
    if D_out_p != D_out or D_in_p != D_in:
        w_fold = jnp.pad(w_fold, ((0, D_out_p - D_out), (0, D_in_p - D_in)))
        bias = jnp.pad(bias, (0, D_out_p - D_out))
    w_t = w_fold.T.astype(mxu_dtype)                          # (D_in_p, D_out_p)
    bias2d = bias.reshape(1, D_out_p)                         # f32 (added to f32 acc)

    phase1_vmem = int(min(_VMEM_LIMIT_CAP,
                          max(32 * _MIB,
                              int(1.25 * vmem_usage(tn, tk, t_out)) + 2 * _MIB)))

    out2d = pl.pallas_call(
        np_block_kernel,
        out_shape=jax.ShapeDtypeStruct((N_p, D_out_p), out_dtype),
        grid_spec=pltpu.PrefetchScalarGridSpec(
            num_scalar_prefetch=0,
            grid=(N_p // tn, D_out_p // t_out, D_in_p // tk),
            in_specs=[
                pl.BlockSpec((tn, tk), lambda i, j, k: (i, k)),      # x row tile
                pl.BlockSpec((tk, t_out), lambda i, j, k: (k, j)),   # folded weight
                pl.BlockSpec((1, t_out), lambda i, j, k: (0, j)),    # bias
            ],
            out_specs=pl.BlockSpec((tn, t_out), lambda i, j, k: (i, j)),
            scratch_shapes=[pltpu.VMEM((tn, t_out), jnp.float32)]),
        compiler_params=pltpu.CompilerParams(
            dimension_semantics=("parallel", "parallel", "arbitrary"),
            vmem_limit_bytes=phase1_vmem),
    )(x2d, w_t, bias2d)

    if N_p != N or D_out_p != D_out:
        out2d = out2d[:N, :D_out]
    return out2d.reshape(B, S, D_out)


def reference_np_block(x, weight, isnorm=True):
    """Pure-JAX reference mirroring the PyTorch forward (training-mode BN)."""
    B, S, D_in = x.shape
    x2d = x.reshape(B * S, D_in).astype(jnp.float32)
    if isnorm:
        mean = jnp.mean(x2d, axis=0, keepdims=True)
        var = jnp.mean((x2d - mean) ** 2, axis=0, keepdims=True)
        x2d = (x2d - mean) / jnp.sqrt(var + 1e-5)
    y = x2d @ weight.T.astype(jnp.float32)
    y = jnp.maximum(y, 0.0)
    return y.reshape(B, S, -1).astype(x.dtype)


if __name__ == "__main__":
    key = jax.random.PRNGKey(0)

    # --- small test (shapes implied by the forward: batch=2, seq=8, hidden=32) ---
    B, S, D_in, D_out = 2, 8, 32, 32
    kx, kw, key = jax.random.split(key, 3)
    x = jax.random.normal(kx, (B, S, D_in), dtype=jnp.float32)
    bound = 1.0 / jnp.sqrt(jnp.float32(D_in))
    weight = jax.random.uniform(kw, (D_out, D_in), dtype=jnp.float32,
                                minval=-bound, maxval=bound)

    out = jax.block_until_ready(base_np_block(x, weight))
    ref = reference_np_block(x, weight)
    assert out.shape == (B, S, D_out)
    assert jnp.allclose(out, ref, atol=1e-4, rtol=1e-4), "mismatch vs reference"

    out_nonorm = jax.block_until_ready(base_np_block(x, weight, isnorm=False))
    ref_nonorm = reference_np_block(x, weight, isnorm=False)
    assert jnp.allclose(out_nonorm, ref_nonorm, atol=1e-4, rtol=1e-4), "isnorm=False mismatch"

    # --- medium test: exercises conditional padding, slicing, multiple row tiles ---
    B2, S2, D_in2, D_out2 = 4, 160, 192, 96
    kx2, kw2, key = jax.random.split(key, 3)
    x2 = jax.random.normal(kx2, (B2, S2, D_in2), dtype=jnp.float32)
    bound2 = 1.0 / jnp.sqrt(jnp.float32(D_in2))
    w2 = jax.random.uniform(kw2, (D_out2, D_in2), dtype=jnp.float32,
                            minval=-bound2, maxval=bound2)
    out2 = jax.block_until_ready(base_np_block(x2, w2))
    ref2 = reference_np_block(x2, w2)
    assert out2.shape == (B2, S2, D_out2)
    assert jnp.allclose(out2, ref2, atol=2e-3, rtol=2e-3), "medium-shape mismatch"

    print("KERNEL_OK")
</pallas_src>

<mosaic_0001>
module attributes {stable_mosaic.version = 11 : i64} {
  func.func @bn_stats_kernel(%arg0: i32, %arg1: memref<16x128xf32, #tpu.memory_space<vmem>>, %arg2: memref<1x2x128xf32, #tpu.memory_space<vmem>>) attributes {dimension_semantics = [#tpu.dimension_semantics<parallel>], iteration_bounds = array<i64: 1>, scalar_prefetch = 0 : i64, scratch_operands = 0 : i64, tpu.core_type = #tpu.core_type<tc>, window_params = [{transform_indices = @transform_0, window_bounds = array<i64: 16, 128>}, {transform_indices = @transform_1, window_bounds = array<i64: 1, 2, 128>}]} {
    %c0 = arith.constant 0 : index
    %c0_0 = arith.constant 0 : index
    %0 = vector.load %arg1[%c0, %c0_0] : memref<16x128xf32, #tpu.memory_space<vmem>>, vector<16x128xf32>
    %cst = arith.constant dense<0.000000e+00> : vector<128xf32>
    %1 = vector.multi_reduction <add>, %0, %cst [0] : vector<16x128xf32> to vector<128xf32>
    %2 = vector.shape_cast %1 : vector<128xf32> to vector<1x128xf32>
    %3 = arith.mulf %0, %0 : vector<16x128xf32>
    %cst_1 = arith.constant dense<0.000000e+00> : vector<128xf32>
    %4 = vector.multi_reduction <add>, %3, %cst_1 [0] : vector<16x128xf32> to vector<128xf32>
    %5 = vector.shape_cast %4 : vector<128xf32> to vector<1x128xf32>
    %6 = tpu.concatenate %2, %5 in 0 : vector<1x128xf32>, vector<1x128xf32> -> vector<2x128xf32>
    %7 = vector.shape_cast %6 : vector<2x128xf32> to vector<1x2x128xf32>
    %c0_2 = arith.constant 0 : index
    %c0_3 = arith.constant 0 : index
    %c0_4 = arith.constant 0 : index
    %8 = vector.load %arg2[%c0_2, %c0_3, %c0_4] : memref<1x2x128xf32, #tpu.memory_space<vmem>>, vector<1x2x128xf32>
    tpu.vector_store %arg2[%c0_2, %c0_3, %c0_4], %7 {strides = array<i32>} : memref<1x2x128xf32, #tpu.memory_space<vmem>>, vector<1x2x128xf32>,
    return
  }
  func.func @transform_0(%arg0: i32) -> (i32, i32) {
    %c0_i32 = arith.constant 0 : i32
    %c0_i32_0 = arith.constant 0 : i32
    return %arg0, %c0_i32 : i32, i32
  }
  func.func @transform_1(%arg0: i32) -> (i32, i32, i32) {
    %c0_i32 = arith.constant 0 : i32
    %c0_i32_0 = arith.constant 0 : i32
    %c0_i32_1 = arith.constant 0 : i32
    return %arg0, %c0_i32, %c0_i32_0 : i32, i32, i32
  }
}

module attributes {stable_mosaic.version = 11 : i64} {
  func.func @np_block_kernel(%arg0: i32, %arg1: i32, %arg2: i32, %arg3: memref<16x128xf32, #tpu.memory_space<vmem>>, %arg4: memref<128x128xf32, #tpu.memory_space<vmem>>, %arg5: memref<1x128xf32, #tpu.memory_space<vmem>>, %arg6: memref<16x128xf32, #tpu.memory_space<vmem>>, %arg7: memref<16x128xf32, #tpu.memory_space<vmem>>) attributes {dimension_semantics = [#tpu.dimension_semantics<parallel>, #tpu.dimension_semantics<parallel>, #tpu.dimension_semantics<arbitrary>], iteration_bounds = array<i64: 1, 1, 1>, scalar_prefetch = 0 : i64, scratch_operands = 1 : i64, tpu.core_type = #tpu.core_type<tc>, window_params = [{transform_indices = @transform_0, window_bounds = array<i64: 16, 128>}, {transform_indices = @transform_1, window_bounds = array<i64: 128, 128>}, {transform_indices = @transform_2, window_bounds = array<i64: 1, 128>}, {transform_indices = @transform_3, window_bounds = array<i64: 16, 128>}]} {
    %c0_i32 = arith.constant 0 : i32
    %0 = arith.cmpi eq, %arg2, %c0_i32 : i32
    %1 = arith.extui %0 : i1 to i32
    %c0_i32_0 = arith.constant 0 : i32
    %2 = arith.cmpi ne, %1, %c0_i32_0 : i32
    scf.if %2 {
      %cst_10 = arith.constant 0.000000e+00 : f32
      %12 = vector.broadcast %cst_10 : f32 to vector<16x128xf32>
      %c0_11 = arith.constant 0 : index
      %c0_12 = arith.constant 0 : index
      %13 = vector.load %arg7[%c0_11, %c0_12] : memref<16x128xf32, #tpu.memory_space<vmem>>, vector<16x128xf32>
      tpu.vector_store %arg7[%c0_11, %c0_12], %12 {strides = array<i32>} : memref<16x128xf32, #tpu.memory_space<vmem>>, vector<16x128xf32>,
    } else {
    }
    %c0 = arith.constant 0 : index
    %c0_1 = arith.constant 0 : index
    %3 = vector.load %arg7[%c0, %c0_1] : memref<16x128xf32, #tpu.memory_space<vmem>>, vector<16x128xf32>
    %c0_2 = arith.constant 0 : index
    %c0_3 = arith.constant 0 : index
    %4 = vector.load %arg3[%c0_2, %c0_3] : memref<16x128xf32, #tpu.memory_space<vmem>>, vector<16x128xf32>
    %c0_4 = arith.constant 0 : index
    %c0_5 = arith.constant 0 : index
    %5 = vector.load %arg4[%c0_4, %c0_5] : memref<128x128xf32, #tpu.memory_space<vmem>>, vector<128x128xf32>
    %cst = arith.constant dense<0.000000e+00> : vector<16x128xf32>
    %6 = tpu.matmul %4, %5, %cst {dimension_numbers = #tpu.dot_dimension_numbers<[1], [0], [0], [1], [0, 0, 1, 1], [], []>} : vector<16x128xf32>, vector<128x128xf32>, vector<16x128xf32> -> vector<16x128xf32>
    %7 = arith.addf %3, %6 : vector<16x128xf32>
    %c0_6 = arith.constant 0 : index
    %c0_7 = arith.constant 0 : index
    %8 = vector.load %arg7[%c0_6, %c0_7] : memref<16x128xf32, #tpu.memory_space<vmem>>, vector<16x128xf32>
    tpu.vector_store %arg7[%c0_6, %c0_7], %7 {strides = array<i32>} : memref<16x128xf32, #tpu.memory_space<vmem>>, vector<16x128xf32>,
    %c0_i32_8 = arith.constant 0 : i32
    %9 = arith.cmpi eq, %arg2, %c0_i32_8 : i32
    %10 = arith.extui %9 : i1 to i32
    %c0_i32_9 = arith.constant 0 : i32
    %11 = arith.cmpi ne, %10, %c0_i32_9 : i32
    scf.if %11 {
      %c0_10 = arith.constant 0 : index
      %c0_11 = arith.constant 0 : index
      %12 = vector.load %arg7[%c0_10, %c0_11] : memref<16x128xf32, #tpu.memory_space<vmem>>, vector<16x128xf32>
      %c0_12 = arith.constant 0 : index
      %c0_13 = arith.constant 0 : index
      %13 = vector.load %arg5[%c0_12, %c0_13] : memref<1x128xf32, #tpu.memory_space<vmem>>, vector<1x128xf32>
      %14 = vector.broadcast %13 : vector<1x128xf32> to vector<16x128xf32>
      %15 = arith.addf %12, %14 : vector<16x128xf32>
      %cst_14 = arith.constant 0.000000e+00 : f32
      %16 = vector.broadcast %cst_14 : f32 to vector<16x128xf32>
      %17 = arith.maximumf %15, %16 : vector<16x128xf32>
      %c0_15 = arith.constant 0 : index
      %c0_16 = arith.constant 0 : index
      %18 = vector.load %arg6[%c0_15, %c0_16] : memref<16x128xf32, #tpu.memory_space<vmem>>, vector<16x128xf32>
      tpu.vector_store %arg6[%c0_15, %c0_16], %17 {strides = array<i32>} : memref<16x128xf32, #tpu.memory_space<vmem>>, vector<16x128xf32>,
    } else {
    }
    return
  }
  func.func @transform_0(%arg0: i32, %arg1: i32, %arg2: i32) -> (i32, i32) {
    %c0_i32 = arith.constant 0 : i32
    return %arg0, %arg2 : i32, i32
  }
  func.func @transform_1(%arg0: i32, %arg1: i32, %arg2: i32) -> (i32, i32) {
    %c0_i32 = arith.constant 0 : i32
    return %arg2, %arg1 : i32, i32
  }
  func.func @transform_2(%arg0: i32, %arg1: i32, %arg2: i32) -> (i32, i32) {
    %c0_i32 = arith.constant 0 : i32
    %c0_i32_0 = arith.constant 0 : i32
    return %c0_i32, %arg1 : i32, i32
  }
  func.func @transform_3(%arg0: i32, %arg1: i32, %arg2: i32) -> (i32, i32) {
    %c0_i32 = arith.constant 0 : i32
    return %arg0, %arg1 : i32, i32
  }
}

</mosaic_0001>

<bundles_post_ra>
// kernel: base_np_block.2
= control target key start
LH: loop header
LB: loop body
LE: loop exit
PB: predicated region body
PF: predicated region fallthrough
CT: control target
= control target key end

     0   :  { %vm26_vm0 = vcmask 1040384   ;;  %s52_s0 = inlined_call_operand.vmem [shape: f32[16,128], index: 0, kind: input, shape index: {}]   ;;  %s53_s1 = inlined_call_operand.vmem [shape: f32[1,2,128], index: 1, kind: output, shape index: {}]  }
   0x1   :  { %v8_v0 = vld [vmem:[%s52_s0] sm:$0xff]  ;;  %v9_v1 = vld [vmem:[%s52_s0 + $0x8] sm:$0xff] }
   0x2   :  { %v10_v2 = vadd.f32 %v9_v1, %v8_v0  ;;  %v17_v3 = vmul.f32 %v8_v0, %v8_v0  ;;  %v18_v4 = vmul.f32 %v9_v1, %v9_v1 }
   0x4   :  { %v11_v5 = vrot.slane %v10_v2, 4  ;;  %v19_v6 = vadd.f32 %v18_v4, %v17_v3 }
   0x6   :  { %v12_v7 = vadd.f32 %v11_v5, %v10_v2  ;;  %v20_v8 = vrot.slane %v19_v6, 4 }
   0x8   :  { %v13_v9 = vrot.slane %v12_v7, 2  ;;  %v21_v10 = vadd.f32 %v20_v8, %v19_v6 }
   0xa   :  { %v14_v11 = vadd.f32 %v13_v9, %v12_v7  ;;  %v22_v12 = vrot.slane %v21_v10, 2 }
   0xc   :  { %v15_v13 = vrot.slane %v14_v11, 1  ;;  %v23_v14 = vadd.f32 %v22_v12, %v21_v10 }
   0xe   :  { %v16_v15 = vadd.f32 %v15_v13, %v14_v11  ;;  %v24_v16 = vrot.slane %v23_v14, 1 }
  0x10   :  { %v25_v17 = vadd.f32 %v24_v16, %v23_v14 }
  0x12   :  { %v27_v18 = vsel %vm26_vm0, %v16_v15, %v25_v17 }
  0x13   :  { %28 = vst [vmem:[%s53_s1] sm:$0x3] %v27_v18 }

// kernel: base_np_block.3
= control target key start
LH: loop header
LB: loop body
LE: loop exit
PB: predicated region body
PF: predicated region fallthrough
CT: control target
= control target key end

     0   :  { %s278_s1 = inlined_call_operand.vmem [shape: f32[128,128], index: 1, kind: input, shape index: {}]   ;;  %s279_s0 = inlined_call_operand.vmem [shape: f32[16,128], index: 0, kind: input, shape index: {}]   ;;  %s280_s2 = inlined_call_operand.vmem [shape: f32[1,128], index: 2, kind: input, shape index: {}]   ;;  %s281_s3 = inlined_call_operand.vmem [shape: f32[16,128], index: 3, kind: output, shape index: {}]  }
   0x1   :  { %v39_v0 = vld [vmem:[%s278_s1 + $0x78] sm:$0xff]  ;;  %v38_v1 = vld [vmem:[%s278_s1 + $0x70] sm:$0xff]  ;;  %v37_v2 = vld [vmem:[%s278_s1 + $0x68] sm:$0xff] }
   0x2   :  { %160 = vmatprep.subr.mxu0 %v39_v0  ;;  %v36_v3 = vld [vmem:[%s278_s1 + $0x60] sm:$0xff]  ;;  %v35_v5 = vld [vmem:[%s278_s1 + $0x58] sm:$0xff]  ;;  %v34_v6 = vld [vmem:[%s278_s1 + $0x50] sm:$0xff] }
   0x3   :  { %161 = vmatpush3.msra.mxu0 %v39_v0  ;;  %v22_v4 = vld [vmem:[%s279_s0] sm:$0xff]  ;;  %v33_v7 = vld [vmem:[%s278_s1 + $0x48] sm:$0xff]  ;;  %v31_v9 = vld [vmem:[%s278_s1 + $0x38] sm:$0xff] }
   0x4   :  { %162 = vmatprep.subr.mxu0 %v38_v1  ;;  %192 = vmatprep.mubr.f32.mxu0 %v22_v4  ;;  %v32_v8 = vld [vmem:[%s278_s1 + $0x40] sm:$0xff]  ;;  %v30_v10 = vld [vmem:[%s278_s1 + $0x30] sm:$0xff]  ;;  %v29_v11 = vld [vmem:[%s278_s1 + $0x28] sm:$0xff] }
   0x5   :  { %163 = vmatpush3.msra.mxu0 %v38_v1  ;;  %v28_v12 = vld [vmem:[%s278_s1 + $0x20] sm:$0xff]  ;;  %v27_v13 = vld [vmem:[%s278_s1 + $0x18] sm:$0xff]  ;;  %v26_v14 = vld [vmem:[%s278_s1 + $0x10] sm:$0xff] }
   0x6   :  { %164 = vmatprep.subr.mxu0 %v37_v2  ;;  %v25_v15 = vld [vmem:[%s278_s1 + $0x8] sm:$0xff]  ;;  %v24_v16 = vld [vmem:[%s278_s1] sm:$0xff] }
   0x7   :  { %165 = vmatpush3.msra.mxu0 %v37_v2  ;;  %v23_v17 = vld [vmem:[%s279_s0 + $0x8] sm:$0xff]  ;;  %v141_v18 = vld [vmem:[%s280_s2] ss:$0 sm:$0xff] }
   0x8   :  { %166 = vmatprep.subr.mxu0 %v36_v3 }
   0x9   :  { %167 = vmatpush3.msra.mxu0 %v36_v3 }
   0xa   :  { %168 = vmatprep.subr.mxu0 %v35_v5 }
   0xb   :  { %169 = vmatpush3.msra.mxu0 %v35_v5 }
   0xc   :  { %170 = vmatprep.subr.mxu0 %v34_v6 }
   0xd   :  { %171 = vmatpush3.msra.mxu0 %v34_v6 }
   0xe   :  { %172 = vmatprep.subr.mxu0 %v33_v7 }
   0xf   :  { %173 = vmatpush3.msra.mxu0 %v33_v7 }
  0x10   :  { %174 = vmatprep.subr.mxu0 %v32_v8 }
  0x11   :  { %175 = vmatpush3.msra.mxu0 %v32_v8 }
  0x12   :  { %176 = vmatprep.subr.mxu0 %v31_v9 }
  0x13   :  { %177 = vmatpush3.msra.mxu0 %v31_v9 }
  0x14   :  { %178 = vmatprep.subr.mxu0 %v30_v10 }
  0x15   :  { %179 = vmatpush3.msra.mxu0 %v30_v10 }
  0x16   :  { %180 = vmatprep.subr.mxu0 %v29_v11 }
  0x17   :  { %181 = vmatpush3.msra.mxu0 %v29_v11 }
  0x18   :  { %182 = vmatprep.subr.mxu0 %v28_v12 }
  0x19   :  { %183 = vmatpush3.msra.mxu0 %v28_v12 }
  0x1a   :  { %184 = vmatprep.subr.mxu0 %v27_v13 }
  0x1b   :  { %185 = vmatpush3.msra.mxu0 %v27_v13 }
  0x1c   :  { %186 = vmatprep.subr.mxu0 %v26_v14 }
  0x1d   :  { %187 = vmatpush3.msra.mxu0 %v26_v14 }
  0x1e   :  { %188 = vmatprep.subr.mxu0 %v25_v15 }
  0x1f   :  { %189 = vmatpush3.msra.mxu0 %v25_v15 }
  0x20   :  { %190 = vmatprep.subr.mxu0 %v24_v16 }
  0x21   :  { %191 = vmatpush3.msra.mxu0 %v24_v16 }
  0x22   :  { %193 = vmatmul.mubr.f32.vlgmr.msra.gmra.mxu0 %v23_v17 }
  0xe2   :  { %v194_v19 = vpop.f32.mrf.mxu0 }
  0xe3   :  { %v132_v20 = vadd.f32 %v194_v19, %v141_v18 }
  0xe4   :  { %v106_v21 = vpop.f32.mrf.mxu0 }
  0xe5   :  { %v134_v22 = vmax.f32 %v132_v20, 0.0  ;;  %v131_v23 = vadd.f32 %v141_v18, %v106_v21 }
  0xe7   :  { %136 = vst [vmem:[%s281_s3 + $0x8] sm:$0xff] %v134_v22  ;;  %v133_v24 = vmax.f32 %v131_v23, 0.0 }
  0xe9   :  { %135 = vst [vmem:[%s281_s3] sm:$0xff] %v133_v24 }

</bundles_post_ra>
